<compile_context>
chip_gen: v7x
topology: tpu7x:2x2x1
jax: 0.10.0
libtpu: 0.0.40
codegen_flags: <defaults>
</compile_context>

<pallas_src>
import functools

import numpy as np
import jax
import jax.numpy as jnp
from jax.experimental import pallas as pl
from jax.experimental.pallas import tpu as pltpu


def _round_up(n, m):
    return (n + m - 1) // m * m


def _las_kernel(x_ref, tgt_ref, smooth_ref, out_ref, *, batch):
    i = pl.program_id(0)

    x = x_ref[...].astype(jnp.float32)   # (TB, C) logits tile, upcast per-tile
    tgt = tgt_ref[...]                   # (TB, 1) i32 targets tile
    smooth = smooth_ref[...]             # (1, C)  f32 per-class smoothing (resident)
    tb, c = x.shape

    # Row-wise logsumexp and row sum -- no full logprobs materialization.
    m = jnp.max(x, axis=-1, keepdims=True)                                  # (TB,1)
    # TODO(synk): if EUP-bound on v7x, evaluate exp in bf16 (x - m <= 0 so
    # range-safe) and accumulate the sum in f32.
    lse = jnp.log(jnp.sum(jnp.exp(x - m), axis=-1, keepdims=True)) + m      # (TB,1)
    sum_x = jnp.sum(x, axis=-1, keepdims=True)                              # (TB,1)

    # Gather x[i, t_i] and smooth[t_i] with a lane-index select.
    lane = jax.lax.broadcasted_iota(jnp.int32, (1, c), 1)                   # (1,C)
    sel = lane == tgt                                                       # (TB,C)
    x_t = jnp.sum(jnp.where(sel, x, 0.0), axis=-1, keepdims=True)           # (TB,1)
    smoothing = jnp.sum(jnp.where(sel, smooth, 0.0), axis=-1, keepdims=True)

    nll_loss = lse - x_t                                                    # (TB,1)
    smooth_loss = lse - sum_x * (1.0 / c)                                   # (TB,1)
    loss = (1.0 - smoothing) * nll_loss + smoothing * smooth_loss           # (TB,1)

    # Mask rows past the real batch (ragged tail block) BEFORE the tile sum;
    # garbage tail rows are row-local and fully discarded by the select.
    row = jax.lax.broadcasted_iota(jnp.int32, (tb, 1), 0) + i * tb
    loss = jnp.where(row < batch, loss, 0.0)

    # One partial sum per tile; disjoint output blocks -> "parallel" grid axis.
    out_ref[...] = jnp.sum(loss).reshape(1, 1, 1)


def label_aware_smoothing_loss(x, target, smooth, *, tile_rows=None,
                               tile_budget_bytes=2 << 20,
                               vmem_limit_bytes=32 << 20):
    """x: (B, C) logits (any float dtype); target: (B,) int; smooth: (C,) f32."""
    B, C = x.shape

    if tile_rows is None:
        # Budget by the f32 working set of one tile (the in-kernel temps are
        # the dominant VMEM cost), independent of the streamed input dtype.
        max_rows = max(8, (tile_budget_bytes // (C * 4)) // 8 * 8)
        tile_rows = int(min(max_rows, _round_up(B, 8)))
    tile_rows = max(8, _round_up(int(tile_rows), 8))

    num_tiles = pl.cdiv(B, tile_rows)

    tgt2d = target.astype(jnp.int32).reshape(B, 1)          # unpadded, int32
    smooth2d = smooth.astype(jnp.float32).reshape(1, C)

    kernel = functools.partial(_las_kernel, batch=B)

    partials = pl.pallas_call(
        kernel,
        out_shape=jax.ShapeDtypeStruct((num_tiles, 1, 1), jnp.float32),
        grid=(num_tiles,),
        in_specs=[
            pl.BlockSpec((tile_rows, C), lambda i: (i, 0)),   # x: streamed, native dtype
            pl.BlockSpec((tile_rows, 1), lambda i: (i, 0)),   # targets: streamed
            pl.BlockSpec((1, C), lambda i: (0, 0)),           # smooth: VMEM-resident
        ],
        out_specs=pl.BlockSpec((1, 1, 1), lambda i: (i, 0, 0)),  # per-tile partial
        compiler_params=pltpu.CompilerParams(
            dimension_semantics=("parallel",),                # both TCs on v7x
            vmem_limit_bytes=vmem_limit_bytes,
        ),
    )(x, tgt2d, smooth2d)

    # Final reduction + divide-by-B over num_tiles floats in plain JAX.
    return jnp.sum(partials) * (1.0 / B)


def make_smooth(cls_num_list, smooth_head, smooth_tail, shape="concave", power=None):
    """Deterministic parameter setup mirroring LabelAwareSmoothing.__init__."""
    cls = np.asarray(cls_num_list, dtype=np.float64)
    n_1 = cls.max()
    n_K = cls.min()
    if shape == "concave":
        smooth = smooth_tail + (smooth_head - smooth_tail) * np.sin(
            (cls - n_K) * np.pi / (2 * (n_1 - n_K)))
    elif shape == "linear":
        smooth = smooth_tail + (smooth_head - smooth_tail) * (cls - n_K) / (n_1 - n_K)
    elif shape == "convex":
        smooth = smooth_head + (smooth_head - smooth_tail) * np.sin(
            1.5 * np.pi + (cls - n_K) * np.pi / (2 * (n_1 - n_K)))
    elif shape == "exp" and power is not None:
        smooth = smooth_tail + (smooth_head - smooth_tail) * np.power(
            (cls - n_K) / (n_1 - n_K), power)
    else:
        raise ValueError("bad shape")
    return jnp.asarray(smooth, dtype=jnp.float32)


def _reference_loss(x, target, smooth):
    smoothing = smooth[target]
    confidence = 1.0 - smoothing
    logprobs = jax.nn.log_softmax(x, axis=-1)
    nll = -jnp.take_along_axis(logprobs, target[:, None], axis=-1)[:, 0]
    smooth_loss = -jnp.mean(logprobs, axis=-1)
    return jnp.mean(confidence * nll + smoothing * smooth_loss)


if __name__ == "__main__":
    B, C = 20, 128  # batch (not a multiple of the tile -> exercises ragged tail)

    key = jax.random.PRNGKey(0)
    kx, kt = jax.random.split(key)
    x = jax.random.normal(kx, (B, C), dtype=jnp.float32)
    target = jax.random.randint(kt, (B,), 0, C, dtype=jnp.int32)

    # Deterministic long-tailed class-count list (max first, min last).
    cls_num_list = [int(v) for v in np.linspace(1000, 10, C)]
    smooth = make_smooth(cls_num_list, smooth_head=0.4, smooth_tail=0.1,
                         shape="concave")

    ref = _reference_loss(x, target, smooth)

    # 1) Multi-tile grid + ragged last block (f32 streaming).
    loss = label_aware_smoothing_loss(x, target, smooth, tile_rows=8)
    jax.block_until_ready(loss)
    assert np.allclose(np.asarray(loss), np.asarray(ref), rtol=1e-5, atol=1e-5), (
        float(loss), float(ref))

    # 2) Default byte-budgeted tile (single padded block covering the batch).
    loss_auto = label_aware_smoothing_loss(x, target, smooth)
    jax.block_until_ready(loss_auto)
    assert np.allclose(np.asarray(loss_auto), np.asarray(ref), rtol=1e-5, atol=1e-5), (
        float(loss_auto), float(ref))

    # 3) bf16 logits streamed in their native dtype, upcast per-tile in-kernel.
    x_bf = x.astype(jnp.bfloat16)
    loss_bf = label_aware_smoothing_loss(x_bf, target, smooth, tile_rows=16)
    jax.block_until_ready(loss_bf)
    ref_bf = _reference_loss(x_bf.astype(jnp.float32), target, smooth)
    assert np.allclose(np.asarray(loss_bf), np.asarray(ref_bf), rtol=1e-4, atol=1e-4), (
        float(loss_bf), float(ref_bf))

    print("KERNEL_OK")
</pallas_src>

<mosaic_0001>
module attributes {stable_mosaic.version = 11 : i64} {
  func.func @_las_kernel(%arg0: i32, %arg1: memref<8x128xf32, #tpu.memory_space<vmem>>, %arg2: memref<8x1xi32, #tpu.memory_space<vmem>>, %arg3: memref<1x128xf32, #tpu.memory_space<vmem>>, %arg4: memref<1x1x1xf32, #tpu.memory_space<vmem>>) attributes {dimension_semantics = [#tpu.dimension_semantics<parallel>], iteration_bounds = array<i64: 3>, scalar_prefetch = 0 : i64, scratch_operands = 0 : i64, tpu.core_type = #tpu.core_type<tc>, window_params = [{transform_indices = @transform_0, window_bounds = array<i64: 8, 128>}, {transform_indices = @transform_1, window_bounds = array<i64: 8, 1>}, {pipeline_mode = #tpu.pipeline_mode<synchronous>, transform_indices = @transform_2, window_bounds = array<i64: 1, 128>}, {transform_indices = @transform_3, window_bounds = array<i64: 1, 1, 1>}]} {
    %c0 = arith.constant 0 : index
    %c0_0 = arith.constant 0 : index
    %0 = vector.load %arg1[%c0, %c0_0] : memref<8x128xf32, #tpu.memory_space<vmem>>, vector<8x128xf32>
    %c0_1 = arith.constant 0 : index
    %c0_2 = arith.constant 0 : index
    %1 = vector.load %arg2[%c0_1, %c0_2] : memref<8x1xi32, #tpu.memory_space<vmem>>, vector<8x1xi32>
    %c0_3 = arith.constant 0 : index
    %c0_4 = arith.constant 0 : index
    %2 = vector.load %arg3[%c0_3, %c0_4] : memref<1x128xf32, #tpu.memory_space<vmem>>, vector<1x128xf32>
    %cst = arith.constant dense<0xFF800000> : vector<8xf32>
    %3 = vector.multi_reduction <maximumf>, %0, %cst [1] : vector<8x128xf32> to vector<8xf32>
    %4 = vector.shape_cast %3 : vector<8xf32> to vector<8x1xf32>
    %5 = vector.broadcast %4 : vector<8x1xf32> to vector<8x128xf32>
    %6 = arith.subf %0, %5 : vector<8x128xf32>
    %7 = math.exp %6 : vector<8x128xf32>
    %cst_5 = arith.constant dense<0.000000e+00> : vector<8xf32>
    %8 = vector.multi_reduction <add>, %7, %cst_5 [1] : vector<8x128xf32> to vector<8xf32>
    %9 = vector.shape_cast %8 : vector<8xf32> to vector<8x1xf32>
    %10 = math.log %9 : vector<8x1xf32>
    %11 = arith.addf %10, %4 : vector<8x1xf32>
    %cst_6 = arith.constant dense<0.000000e+00> : vector<8xf32>
    %12 = vector.multi_reduction <add>, %0, %cst_6 [1] : vector<8x128xf32> to vector<8xf32>
    %13 = vector.shape_cast %12 : vector<8xf32> to vector<8x1xf32>
    %14 = tpu.iota {dimensions = array<i32: 1>} : vector<1x128xi32>
    %15 = vector.broadcast %14 : vector<1x128xi32> to vector<8x128xi32>
    %16 = vector.broadcast %1 : vector<8x1xi32> to vector<8x128xi32>
    %17 = arith.cmpi eq, %15, %16 : vector<8x128xi32>
    %cst_7 = arith.constant 0.000000e+00 : f32
    %18 = vector.broadcast %cst_7 : f32 to vector<8x128xf32>
    %19 = arith.select %17, %0, %18 : vector<8x128xi1>, vector<8x128xf32>
    %cst_8 = arith.constant dense<0.000000e+00> : vector<8xf32>
    %20 = vector.multi_reduction <add>, %19, %cst_8 [1] : vector<8x128xf32> to vector<8xf32>
    %21 = vector.shape_cast %20 : vector<8xf32> to vector<8x1xf32>
    %cst_9 = arith.constant 0.000000e+00 : f32
    %22 = vector.shape_cast %2 : vector<1x128xf32> to vector<1x128xf32>
    %23 = vector.broadcast %22 : vector<1x128xf32> to vector<8x128xf32>
    %24 = vector.broadcast %cst_9 : f32 to vector<8x128xf32>
    %25 = arith.select %17, %23, %24 : vector<8x128xi1>, vector<8x128xf32>
    %cst_10 = arith.constant dense<0.000000e+00> : vector<8xf32>
    %26 = vector.multi_reduction <add>, %25, %cst_10 [1] : vector<8x128xf32> to vector<8xf32>
    %27 = vector.shape_cast %26 : vector<8xf32> to vector<8x1xf32>
    %28 = arith.subf %11, %21 : vector<8x1xf32>
    %cst_11 = arith.constant 7.812500e-03 : f32
    %29 = vector.broadcast %cst_11 : f32 to vector<8x1xf32>
    %30 = arith.mulf %13, %29 : vector<8x1xf32>
    %31 = arith.subf %11, %30 : vector<8x1xf32>
    %cst_12 = arith.constant 1.000000e+00 : f32
    %32 = vector.broadcast %cst_12 : f32 to vector<8x1xf32>
    %33 = arith.subf %32, %27 : vector<8x1xf32>
    %34 = arith.mulf %33, %28 : vector<8x1xf32>
    %35 = arith.mulf %27, %31 : vector<8x1xf32>
    %36 = arith.addf %34, %35 : vector<8x1xf32>
    %37 = tpu.iota {dimensions = array<i32: 0>} : vector<8x1xi32>
    %c8_i32 = arith.constant 8 : i32
    %38 = arith.muli %arg0, %c8_i32 : i32
    %39 = vector.broadcast %38 : i32 to vector<8x1xi32>
    %40 = arith.addi %37, %39 : vector<8x1xi32>
    %c20_i32 = arith.constant 20 : i32
    %41 = vector.broadcast %c20_i32 : i32 to vector<8x1xi32>
    %42 = arith.cmpi slt, %40, %41 : vector<8x1xi32>
    %cst_13 = arith.constant 0.000000e+00 : f32
    %43 = vector.broadcast %cst_13 : f32 to vector<8x1xf32>
    %44 = arith.select %42, %36, %43 : vector<8x1xi1>, vector<8x1xf32>
    %45 = vector.shape_cast %44 : vector<8x1xf32> to vector<1x8x1xf32>
    %cst_14 = arith.constant dense<0.000000e+00> : vector<1xf32>
    %46 = vector.multi_reduction <add>, %45, %cst_14 [1, 2] : vector<1x8x1xf32> to vector<1xf32>
    %47 = vector.shape_cast %46 : vector<1xf32> to vector<1x1x1xf32>
    %48 = vector.extract %47[0, 0, 0] : f32 from vector<1x1x1xf32>
    %49 = vector.broadcast %48 : f32 to vector<1x1x1xf32>
    %c0_15 = arith.constant 0 : index
    %c0_16 = arith.constant 0 : index
    %c0_17 = arith.constant 0 : index
    %50 = vector.load %arg4[%c0_15, %c0_16, %c0_17] : memref<1x1x1xf32, #tpu.memory_space<vmem>>, vector<1x1x1xf32>
    tpu.vector_store %arg4[%c0_15, %c0_16, %c0_17], %49 {strides = array<i32>} : memref<1x1x1xf32, #tpu.memory_space<vmem>>, vector<1x1x1xf32>,
    return
  }
  func.func @transform_0(%arg0: i32) -> (i32, i32) {
    %c0_i32 = arith.constant 0 : i32
    %c0_i32_0 = arith.constant 0 : i32
    return %arg0, %c0_i32 : i32, i32
  }
  func.func @transform_1(%arg0: i32) -> (i32, i32) {
    %c0_i32 = arith.constant 0 : i32
    %c0_i32_0 = arith.constant 0 : i32
    return %arg0, %c0_i32 : i32, i32
  }
  func.func @transform_2(%arg0: i32) -> (i32, i32) {
    %c0_i32 = arith.constant 0 : i32
    %c0_i32_0 = arith.constant 0 : i32
    %c0_i32_1 = arith.constant 0 : i32
    return %c0_i32, %c0_i32_0 : i32, i32
  }
  func.func @transform_3(%arg0: i32) -> (i32, i32, i32) {
    %c0_i32 = arith.constant 0 : i32
    %c0_i32_0 = arith.constant 0 : i32
    %c0_i32_1 = arith.constant 0 : i32
    return %arg0, %c0_i32, %c0_i32_0 : i32, i32, i32
  }
}

</mosaic_0001>

<bundles_post_ra>
// kernel: tpu_custom_call.1
= control target key start
LH: loop header
LB: loop body
LE: loop exit
PB: predicated region body
PF: predicated region fallthrough
CT: control target
= control target key end

     0   :  { %s357_s12 = smov 0   ;;  %s389_s0 = inlined_call_operand.vmem [shape: f32[20,128], index: 0, kind: input, shape index: {}]   ;;  %s390_s1 = inlined_call_operand.vmem [shape: s32[20,1], index: 1, kind: input, shape index: {}]   ;;  %s391_s2 = inlined_call_operand.vmem [shape: f32[1,128], index: 2, kind: input, shape index: {}]   ;;  %s392_s3 = inlined_call_operand.vmem [shape: f32[3,1,1], index: 3, kind: output, shape index: {}]  }
   0x1 LB: > { %s363_s13 = sadd.s32 4294967295, %s334_s12   ;;  %p305_p0 = scmp.ge.s32.totalorder %s334_s12, 1  ;;  %s334_s12 = sphi %s357_s12, %s13_s12  }
   0x2   : > { %p145_p1 = scmp.lt.s32.totalorder %s334_s12, 4 }
   0x4   : > { %p146_p2 = pnand %p305_p0, %p145_p1 }
   0x5   : > { %p170_p3 = scmp.lt.s32.totalorder (!%p146_p2), %s363_s13, 2  ;;  %v336_v0 = vmov (!%p146_p2), 0   ;;  %v196_v6 = vlaneseq (!%p146_p2)  ;;  %v308_v11 = vld [vmem:[%s391_s2] ss:$0 sm:$0xff] (!%p146_p2)  ;;  %s309_s24 = sshll.u32 (!%p146_p2), %s363_s13, 3  ;;  %vm228_vm2 = vcmask (!%p146_p2), 7168  }
   0x6   : > { %149 = sbr.rel (%p146_p2) target bundleno = 546 (0x222), region = 32  ;;  %323 = vset.pattern.permute.xlu0 (!%p146_p2), %v336_v0  ;;  %v224_v19 = vstv (!%p146_p2), %s309_s24  ;;  %vm240_vm3 = vcmask (!%p146_p2), 0  }
   0x7   : > { %v197_v7 = vand.u32 (!%p146_p2), 127, %v196_v6  ;;  %v222_v17 = vshrl.u32 (!%p146_p2), %v196_v6, 7 }
   0x9   : > { %v225_v23 = vadd.s32 (!%p146_p2), %v224_v19, %v222_v17 }
   0xb   : > { %vm226_vm1 = vcmp.lt.s32.totalorder (!%p146_p2), %v225_v23, 20 }
   0xd   : > { %s369_s14 = scalar_select %p170_p3, %s363_s13, 2 }
   0xf   : > { %s306_s15 = sshll.u32 %s369_s14, 3  ;;  %s180_s27 = scalar_lea.vmem %s392_s3, %s369_s14 }
  0x10   : > { %s173_s18 = scalar_lea.vmem %s389_s0, %s306_s15  ;;  %s177_s21 = scalar_lea.vmem %s390_s1, %s306_s15 }
  0x11   : > { %v181_v1 = vld [vmem:[%s173_s18] sm:$0xff] }
  0x12   : > { %184 = vmax.xlane.f32.xlu0 %v181_v1  ;;  %v182_v2 = vld [vmem:[%s177_s21] sm:$0xff] }
  0x28   : > { %199 = vperm.xlu0 %323, %v182_v2  }
  0x9f   : > { %v185_v3 = vpop.xlane.xlu0 %184 }
  0xa0   : > { %v186_v4 = vsub.f32 %v181_v1, %v185_v3 }
  0xa2   : > { %v187_v5 = vmul.f32 1.442695, %v186_v4 }
  0xa4   : > { %324 = vpow2.f32 %v187_v5 }
  0xa7   : > { %v200_v9 = vpop.permute.xlu0 %199 }
  0xa8   : > { %vm201_vm0 = vcmp.eq.s32.totalorder %v197_v7, %v200_v9 }
  0xa9   : > { %v202_v10 = vsel %vm201_vm0, %v181_v1, 0.0  ;;  %v211_v12 = vsel %vm201_vm0, %v308_v11, 0.0 }
  0xae   : > { %v325_v8 = vpop.eup %324 }
  0xaf   : > { %189 = vadd.xlane.f32.xlu1 %v325_v8 }
  0xb3   : > { %194 = vadd.xlane.f32.xlu1 %v181_v1 }
  0xb7   : > { %203 = vadd.xlane.f32.xlu1 %v202_v10 }
  0xbb   : > { %212 = vadd.xlane.f32.xlu1 %v211_v12 }
 0x13c   : > { %v190_v13 = vpop.xlane.xlu1 %189 }
 0x13d   : > { %326 = vlog2.f32 %v190_v13 }
 0x140   : > { %v195_v14 = vpop.xlane.xlu1 %194 }
 0x141   : > { %v215_v22 = vmul.f32 0.0078125, %v195_v14 }
 0x144   : > { %v204_v15 = vpop.xlane.xlu1 %203 }
 0x147   : > { %v327_v16 = vpop.eup %326 }
 0x148   : > { %v192_v18 = vmul.f32 0.6931472, %v327_v16  ;;  %v213_v20 = vpop.xlane.xlu1 %212 }
 0x149   : > { %v217_v26 = vsub.f32 1.0, %v213_v20 }
 0x14a   : > { %v193_v21 = vadd.f32 %v192_v18, %v185_v3 }
 0x14c   : > { %v216_v24 = vsub.f32 %v193_v21, %v215_v22  ;;  %v214_v25 = vsub.f32 %v193_v21, %v204_v15 }
 0x14e   : > { %v218_v27 = vmul.f32 %v217_v26, %v214_v25  ;;  %v219_v28 = vmul.f32 %v216_v24, %v213_v20 }
 0x150   : > { %v220_v29 = vadd.f32 %v219_v28, %v218_v27 }
 0x152   : > { %v227_v30 = vsel %vm226_vm1, %v220_v29, 0.0 }
 0x153   : > { %v229_v31 = vsel %vm228_vm2, %v227_v30, 0.0 }
 0x154   : > { %230 = vadd.xlane.f32.xlu1 %v229_v31 }
 0x1e1   : > { %v231_v32 = vpop.xlane.xlu1 %230 }
 0x1e2   : > { %v232_v33 = vrot.slane %v231_v32, 4 }
 0x1e4   : > { %v233_v34 = vadd.f32 %v232_v33, %v231_v32 }
 0x1e6   : > { %v234_v35 = vrot.slane %v233_v34, 2 }
 0x1e8   : > { %v235_v36 = vadd.f32 %v234_v35, %v233_v34 }
 0x1ea   : > { %v236_v37 = vrot.slane %v235_v36, 1 }
 0x1ec   : > { %v237_v38 = vadd.f32 %v236_v37, %v235_v36 }
 0x1ee   : > { %312 = vpush %v237_v38 }
 0x21f   : > { %s313_s28 = spop %312 }
 0x220   : > { %v239_v39 = vstv %s313_s28 }
 0x221   : > { %241 = vst.msk [vmem:[%s180_s27] sm:$0x1] %vm240_vm3, %v239_v39 }
 0x222 PF: > { %s13_s12 = sadd.s32 1, %s334_s12  }
 0x223   : > { %p10_p4 = scmp.ge.s32.totalorder %s13_s12, 5  }
 0x225   :  { %12 = sbr.rel (!%p10_p4) target bundleno = 1 (0x1), region = 65 }

</bundles_post_ra>
